<compile_context>
chip_gen: v7x
topology: tpu7x:2x2x1
jax: 0.10.0
libtpu: 0.0.40
codegen_flags: <defaults>
</compile_context>

<pallas_src>
import jax
import jax.numpy as jnp
from jax import lax
from jax.experimental import pallas as pl
from jax.experimental.pallas import tpu as pltpu

EPS = 1e-5  # nn.InstanceNorm2d default eps (affine=False, no running stats)


def _upnoise_kernel(p_ref, w_ref, o_ref):
    # p_ref: (1, 9*Cin, HW)   9 shifted views of the 1-padded input, lane = HW
    # w_ref: (8, Cout, 2*Cin) per-(di, dj, dh) 2-tap weight chunks
    # o_ref: (1, 4, Cout, HW) normalized + ReLU'd sub-pixel planes, lane = HW
    cout = w_ref.shape[1]
    c2 = w_ref.shape[2]            # 2 * Cin
    cin = c2 // 2
    hw = p_ref.shape[2]

    ys = []
    s1 = jnp.zeros((cout, 1), jnp.float32)   # per-channel sum
    s2 = jnp.zeros((cout, 1), jnp.float32)   # per-channel sum of squares
    for di in range(2):
        for dj in range(2):
            acc = None
            for dh in range(2):
                r0 = ((di + dh) * 3 + dj) * cin          # static slice start
                w = w_ref[(di * 2 + dj) * 2 + dh]        # (Cout, 2*Cin)
                p = p_ref[0, r0:r0 + c2, :]              # (2*Cin, HW)
                part = jnp.dot(w, p, preferred_element_type=jnp.float32)
                acc = part if acc is None else acc + part
            ys.append(acc)                               # (Cout, HW)
            s1 = s1 + jnp.sum(acc, axis=1, keepdims=True)
            s2 = s2 + jnp.sum(acc * acc, axis=1, keepdims=True)

    # InstanceNorm2d: per-(instance, channel) stats over the FULL 2Hx2W extent
    # (all 4 sub-pixel planes), biased variance, eps inside rsqrt, no affine.
    inv_n = 1.0 / (4.0 * hw)
    mean = s1 * inv_n
    var = jnp.maximum(s2 * inv_n - mean * mean, 0.0)
    scale = lax.rsqrt(var + EPS)

    for k in range(4):
        yn = (ys[k] - mean) * scale
        o_ref[0, k] = jnp.maximum(yn, 0.0).astype(o_ref.dtype)   # ReLU


@jax.jit
def unet_up_noise(x, weight):
    """Forward pass of UNetUpNoise.

    x:      (N, Cin, H, W)    float32, NCHW (PyTorch convention)
    weight: (Cin, Cout, 4, 4) float32, ConvTranspose2d weight (bias=False)
    returns (N, Cout, 2H, 2W) float32, NCHW
    """
    N, Cin, H, W = x.shape
    Cout = weight.shape[1]
    HW = H * W

    # Sub-pixel patches: the 9 shifted views of the 1-padded input, flattened
    # to (N, 9*Cin, H*W) with H*W on the minor (lane) axis.  Output pixel
    # (2p+di, 2q+dj) uses taps xp[:, p+di+dh, q+dj+dw], dh,dw in {0,1}.
    xp = jnp.pad(x, ((0, 0), (0, 0), (1, 1), (1, 1)))
    taps = [xp[:, :, sr:sr + H, sc:sc + W] for sr in range(3) for sc in range(3)]
    patches = jnp.stack(taps, axis=1).reshape(N, 9 * Cin, HW)

    # Per-(di, dj, dh) weight chunks: wsub[(di*2+dj)*2+dh, o, dw*Cin+c]
    #   = weight[c, o, (3-di)-2*dh, (3-dj)-2*dw]
    # (contraction axis ordered (dw, c) to match the patch row layout).
    chunks = []
    for di in range(2):
        for dj in range(2):
            for dh in range(2):
                blk = jnp.stack(
                    [weight[:, :, 3 - di - 2 * dh, 3 - dj - 2 * dw]
                     for dw in range(2)], axis=0)                 # (2, Cin, Cout)
                chunks.append(blk.transpose(2, 0, 1).reshape(Cout, 2 * Cin))
    wsub = jnp.stack(chunks, axis=0)                              # (8, Cout, 2*Cin)

    # VMEM budget: double-buffered patch + output blocks, plus weight & headroom.
    p_bytes = 9 * Cin * HW * 4
    o_bytes = 4 * Cout * HW * 4
    w_bytes = 8 * Cout * 2 * Cin * 4
    vmem_limit = 2 * (p_bytes + o_bytes) + w_bytes + (8 << 20)
    vmem_limit = int(max(16 << 20, min(vmem_limit, 64 << 20)))

    out = pl.pallas_call(
        _upnoise_kernel,
        out_shape=jax.ShapeDtypeStruct((N, 4, Cout, HW), jnp.float32),
        grid_spec=pltpu.PrefetchScalarGridSpec(
            num_scalar_prefetch=0,
            grid=(N,),
            in_specs=[
                pl.BlockSpec((1, 9 * Cin, HW), lambda n: (n, 0, 0)),
                pl.BlockSpec((8, Cout, 2 * Cin), lambda n: (0, 0, 0)),
            ],
            out_specs=pl.BlockSpec((1, 4, Cout, HW), lambda n: (n, 0, 0, 0)),
        ),
        compiler_params=pltpu.CompilerParams(
            dimension_semantics=("parallel",),
            vmem_limit_bytes=vmem_limit),
    )(patches, wsub)

    # Pixel shuffle: (N, (di,dj), Cout, (p,q)) -> NCHW (N, Cout, 2H, 2W).
    out = out.reshape(N, 2, 2, Cout, H, W)
    return out.transpose(0, 3, 4, 1, 5, 2).reshape(N, Cout, 2 * H, 2 * W)


def _reference(x, weight):
    """Pure-JAX reference: ConvTranspose2d + InstanceNorm2d + ReLU."""
    w_conv = jnp.transpose(weight[:, :, ::-1, ::-1], (1, 0, 2, 3))  # OIHW
    y = lax.conv_general_dilated(
        x, w_conv, window_strides=(1, 1), padding=((2, 2), (2, 2)),
        lhs_dilation=(2, 2),
        dimension_numbers=("NCHW", "OIHW", "NCHW"))
    mean = jnp.mean(y, axis=(2, 3), keepdims=True)
    var = jnp.mean((y - mean) ** 2, axis=(2, 3), keepdims=True)
    return jnp.maximum((y - mean) * lax.rsqrt(var + EPS), 0.0)


if __name__ == "__main__":
    key = jax.random.PRNGKey(0)
    kx, kw = jax.random.split(key)

    N, Cin, Cout, H, W = 2, 4, 8, 16, 16
    x = jax.random.normal(kx, (N, Cin, H, W), dtype=jnp.float32)
    # Deterministic weight (shape from nn.ConvTranspose2d(in, out, 4)):
    weight = 0.1 * jax.random.normal(kw, (Cin, Cout, 4, 4), dtype=jnp.float32)

    out = jax.block_until_ready(unet_up_noise(x, weight))
    ref = jax.block_until_ready(_reference(x, weight))

    assert out.shape == (N, Cout, 2 * H, 2 * W), out.shape
    assert jnp.allclose(out, ref, rtol=1e-4, atol=1e-4), (
        float(jnp.max(jnp.abs(out - ref))))
    print("KERNEL_OK")
</pallas_src>

<mosaic_0001>
module attributes {stable_mosaic.version = 11 : i64} {
  func.func @_upnoise_kernel(%arg0: i32, %arg1: memref<1x36x256xf32, #tpu.memory_space<vmem>>, %arg2: memref<8x8x8xf32, #tpu.memory_space<vmem>>, %arg3: memref<1x4x8x256xf32, #tpu.memory_space<vmem>>) attributes {dimension_semantics = [#tpu.dimension_semantics<parallel>], iteration_bounds = array<i64: 2>, scalar_prefetch = 0 : i64, scratch_operands = 0 : i64, tpu.core_type = #tpu.core_type<tc>, window_params = [{transform_indices = @transform_0, window_bounds = array<i64: 1, 36, 256>}, {pipeline_mode = #tpu.pipeline_mode<synchronous>, transform_indices = @transform_1, window_bounds = array<i64: 8, 8, 8>}, {transform_indices = @transform_2, window_bounds = array<i64: 1, 4, 8, 256>}]} {
    %cst = arith.constant 0.000000e+00 : f32
    %0 = vector.broadcast %cst : f32 to vector<8x1xf32>
    %cst_0 = arith.constant 0.000000e+00 : f32
    %1 = vector.broadcast %cst_0 : f32 to vector<8x1xf32>
    %c0 = arith.constant 0 : index
    %c0_1 = arith.constant 0 : index
    %c0_2 = arith.constant 0 : index
    %2 = vector.load %arg2[%c0, %c0_1, %c0_2] : memref<8x8x8xf32, #tpu.memory_space<vmem>>, vector<1x8x8xf32>
    %3 = vector.shape_cast %2 : vector<1x8x8xf32> to vector<8x8xf32>
    %c0_3 = arith.constant 0 : index
    %c0_4 = arith.constant 0 : index
    %c0_5 = arith.constant 0 : index
    %4 = vector.load %arg1[%c0_3, %c0_4, %c0_5] : memref<1x36x256xf32, #tpu.memory_space<vmem>>, vector<1x8x256xf32>
    %5 = vector.shape_cast %4 : vector<1x8x256xf32> to vector<8x256xf32>
    %cst_6 = arith.constant dense<0.000000e+00> : vector<8x256xf32>
    %6 = tpu.matmul %3, %5, %cst_6 {dimension_numbers = #tpu.dot_dimension_numbers<[1], [0], [0], [1], [0, 0, 1, 1], [], []>} : vector<8x8xf32>, vector<8x256xf32>, vector<8x256xf32> -> vector<8x256xf32>
    %c1 = arith.constant 1 : index
    %c0_7 = arith.constant 0 : index
    %c0_8 = arith.constant 0 : index
    %7 = vector.load %arg2[%c1, %c0_7, %c0_8] : memref<8x8x8xf32, #tpu.memory_space<vmem>>, vector<1x8x8xf32>
    %8 = vector.shape_cast %7 : vector<1x8x8xf32> to vector<8x8xf32>
    %c0_9 = arith.constant 0 : index
    %c12 = arith.constant 12 : index
    %c0_10 = arith.constant 0 : index
    %9 = vector.load %arg1[%c0_9, %c12, %c0_10] : memref<1x36x256xf32, #tpu.memory_space<vmem>>, vector<1x8x256xf32>
    %10 = vector.shape_cast %9 : vector<1x8x256xf32> to vector<8x256xf32>
    %cst_11 = arith.constant dense<0.000000e+00> : vector<8x256xf32>
    %11 = tpu.matmul %8, %10, %cst_11 {dimension_numbers = #tpu.dot_dimension_numbers<[1], [0], [0], [1], [0, 0, 1, 1], [], []>} : vector<8x8xf32>, vector<8x256xf32>, vector<8x256xf32> -> vector<8x256xf32>
    %12 = arith.addf %6, %11 : vector<8x256xf32>
    %cst_12 = arith.constant dense<0.000000e+00> : vector<8xf32>
    %13 = vector.multi_reduction <add>, %12, %cst_12 [1] : vector<8x256xf32> to vector<8xf32>
    %14 = vector.shape_cast %13 : vector<8xf32> to vector<8x1xf32>
    %15 = arith.addf %0, %14 : vector<8x1xf32>
    %16 = arith.mulf %12, %12 : vector<8x256xf32>
    %cst_13 = arith.constant dense<0.000000e+00> : vector<8xf32>
    %17 = vector.multi_reduction <add>, %16, %cst_13 [1] : vector<8x256xf32> to vector<8xf32>
    %18 = vector.shape_cast %17 : vector<8xf32> to vector<8x1xf32>
    %19 = arith.addf %1, %18 : vector<8x1xf32>
    %c2 = arith.constant 2 : index
    %c0_14 = arith.constant 0 : index
    %c0_15 = arith.constant 0 : index
    %20 = vector.load %arg2[%c2, %c0_14, %c0_15] : memref<8x8x8xf32, #tpu.memory_space<vmem>>, vector<1x8x8xf32>
    %21 = vector.shape_cast %20 : vector<1x8x8xf32> to vector<8x8xf32>
    %c0_16 = arith.constant 0 : index
    %c4 = arith.constant 4 : index
    %c0_17 = arith.constant 0 : index
    %22 = vector.load %arg1[%c0_16, %c4, %c0_17] : memref<1x36x256xf32, #tpu.memory_space<vmem>>, vector<1x8x256xf32>
    %23 = vector.shape_cast %22 : vector<1x8x256xf32> to vector<8x256xf32>
    %cst_18 = arith.constant dense<0.000000e+00> : vector<8x256xf32>
    %24 = tpu.matmul %21, %23, %cst_18 {dimension_numbers = #tpu.dot_dimension_numbers<[1], [0], [0], [1], [0, 0, 1, 1], [], []>} : vector<8x8xf32>, vector<8x256xf32>, vector<8x256xf32> -> vector<8x256xf32>
    %c3 = arith.constant 3 : index
    %c0_19 = arith.constant 0 : index
    %c0_20 = arith.constant 0 : index
    %25 = vector.load %arg2[%c3, %c0_19, %c0_20] : memref<8x8x8xf32, #tpu.memory_space<vmem>>, vector<1x8x8xf32>
    %26 = vector.shape_cast %25 : vector<1x8x8xf32> to vector<8x8xf32>
    %c0_21 = arith.constant 0 : index
    %c16 = arith.constant 16 : index
    %c0_22 = arith.constant 0 : index
    %27 = vector.load %arg1[%c0_21, %c16, %c0_22] : memref<1x36x256xf32, #tpu.memory_space<vmem>>, vector<1x8x256xf32>
    %28 = vector.shape_cast %27 : vector<1x8x256xf32> to vector<8x256xf32>
    %cst_23 = arith.constant dense<0.000000e+00> : vector<8x256xf32>
    %29 = tpu.matmul %26, %28, %cst_23 {dimension_numbers = #tpu.dot_dimension_numbers<[1], [0], [0], [1], [0, 0, 1, 1], [], []>} : vector<8x8xf32>, vector<8x256xf32>, vector<8x256xf32> -> vector<8x256xf32>
    %30 = arith.addf %24, %29 : vector<8x256xf32>
    %cst_24 = arith.constant dense<0.000000e+00> : vector<8xf32>
    %31 = vector.multi_reduction <add>, %30, %cst_24 [1] : vector<8x256xf32> to vector<8xf32>
    %32 = vector.shape_cast %31 : vector<8xf32> to vector<8x1xf32>
    %33 = arith.addf %15, %32 : vector<8x1xf32>
    %34 = arith.mulf %30, %30 : vector<8x256xf32>
    %cst_25 = arith.constant dense<0.000000e+00> : vector<8xf32>
    %35 = vector.multi_reduction <add>, %34, %cst_25 [1] : vector<8x256xf32> to vector<8xf32>
    %36 = vector.shape_cast %35 : vector<8xf32> to vector<8x1xf32>
    %37 = arith.addf %19, %36 : vector<8x1xf32>
    %c4_26 = arith.constant 4 : index
    %c0_27 = arith.constant 0 : index
    %c0_28 = arith.constant 0 : index
    %38 = vector.load %arg2[%c4_26, %c0_27, %c0_28] : memref<8x8x8xf32, #tpu.memory_space<vmem>>, vector<1x8x8xf32>
    %39 = vector.shape_cast %38 : vector<1x8x8xf32> to vector<8x8xf32>
    %c0_29 = arith.constant 0 : index
    %c12_30 = arith.constant 12 : index
    %c0_31 = arith.constant 0 : index
    %40 = vector.load %arg1[%c0_29, %c12_30, %c0_31] : memref<1x36x256xf32, #tpu.memory_space<vmem>>, vector<1x8x256xf32>
    %41 = vector.shape_cast %40 : vector<1x8x256xf32> to vector<8x256xf32>
    %cst_32 = arith.constant dense<0.000000e+00> : vector<8x256xf32>
    %42 = tpu.matmul %39, %41, %cst_32 {dimension_numbers = #tpu.dot_dimension_numbers<[1], [0], [0], [1], [0, 0, 1, 1], [], []>} : vector<8x8xf32>, vector<8x256xf32>, vector<8x256xf32> -> vector<8x256xf32>
    %c5 = arith.constant 5 : index
    %c0_33 = arith.constant 0 : index
    %c0_34 = arith.constant 0 : index
    %43 = vector.load %arg2[%c5, %c0_33, %c0_34] : memref<8x8x8xf32, #tpu.memory_space<vmem>>, vector<1x8x8xf32>
    %44 = vector.shape_cast %43 : vector<1x8x8xf32> to vector<8x8xf32>
    %c0_35 = arith.constant 0 : index
    %c24 = arith.constant 24 : index
    %c0_36 = arith.constant 0 : index
    %45 = vector.load %arg1[%c0_35, %c24, %c0_36] : memref<1x36x256xf32, #tpu.memory_space<vmem>>, vector<1x8x256xf32>
    %46 = vector.shape_cast %45 : vector<1x8x256xf32> to vector<8x256xf32>
    %cst_37 = arith.constant dense<0.000000e+00> : vector<8x256xf32>
    %47 = tpu.matmul %44, %46, %cst_37 {dimension_numbers = #tpu.dot_dimension_numbers<[1], [0], [0], [1], [0, 0, 1, 1], [], []>} : vector<8x8xf32>, vector<8x256xf32>, vector<8x256xf32> -> vector<8x256xf32>
    %48 = arith.addf %42, %47 : vector<8x256xf32>
    %cst_38 = arith.constant dense<0.000000e+00> : vector<8xf32>
    %49 = vector.multi_reduction <add>, %48, %cst_38 [1] : vector<8x256xf32> to vector<8xf32>
    %50 = vector.shape_cast %49 : vector<8xf32> to vector<8x1xf32>
    %51 = arith.addf %33, %50 : vector<8x1xf32>
    %52 = arith.mulf %48, %48 : vector<8x256xf32>
    %cst_39 = arith.constant dense<0.000000e+00> : vector<8xf32>
    %53 = vector.multi_reduction <add>, %52, %cst_39 [1] : vector<8x256xf32> to vector<8xf32>
    %54 = vector.shape_cast %53 : vector<8xf32> to vector<8x1xf32>
    %55 = arith.addf %37, %54 : vector<8x1xf32>
    %c6 = arith.constant 6 : index
    %c0_40 = arith.constant 0 : index
    %c0_41 = arith.constant 0 : index
    %56 = vector.load %arg2[%c6, %c0_40, %c0_41] : memref<8x8x8xf32, #tpu.memory_space<vmem>>, vector<1x8x8xf32>
    %57 = vector.shape_cast %56 : vector<1x8x8xf32> to vector<8x8xf32>
    %c0_42 = arith.constant 0 : index
    %c16_43 = arith.constant 16 : index
    %c0_44 = arith.constant 0 : index
    %58 = vector.load %arg1[%c0_42, %c16_43, %c0_44] : memref<1x36x256xf32, #tpu.memory_space<vmem>>, vector<1x8x256xf32>
    %59 = vector.shape_cast %58 : vector<1x8x256xf32> to vector<8x256xf32>
    %cst_45 = arith.constant dense<0.000000e+00> : vector<8x256xf32>
    %60 = tpu.matmul %57, %59, %cst_45 {dimension_numbers = #tpu.dot_dimension_numbers<[1], [0], [0], [1], [0, 0, 1, 1], [], []>} : vector<8x8xf32>, vector<8x256xf32>, vector<8x256xf32> -> vector<8x256xf32>
    %c7 = arith.constant 7 : index
    %c0_46 = arith.constant 0 : index
    %c0_47 = arith.constant 0 : index
    %61 = vector.load %arg2[%c7, %c0_46, %c0_47] : memref<8x8x8xf32, #tpu.memory_space<vmem>>, vector<1x8x8xf32>
    %62 = vector.shape_cast %61 : vector<1x8x8xf32> to vector<8x8xf32>
    %c0_48 = arith.constant 0 : index
    %c28 = arith.constant 28 : index
    %c0_49 = arith.constant 0 : index
    %63 = vector.load %arg1[%c0_48, %c28, %c0_49] : memref<1x36x256xf32, #tpu.memory_space<vmem>>, vector<1x8x256xf32>
    %64 = vector.shape_cast %63 : vector<1x8x256xf32> to vector<8x256xf32>
    %cst_50 = arith.constant dense<0.000000e+00> : vector<8x256xf32>
    %65 = tpu.matmul %62, %64, %cst_50 {dimension_numbers = #tpu.dot_dimension_numbers<[1], [0], [0], [1], [0, 0, 1, 1], [], []>} : vector<8x8xf32>, vector<8x256xf32>, vector<8x256xf32> -> vector<8x256xf32>
    %66 = arith.addf %60, %65 : vector<8x256xf32>
    %cst_51 = arith.constant dense<0.000000e+00> : vector<8xf32>
    %67 = vector.multi_reduction <add>, %66, %cst_51 [1] : vector<8x256xf32> to vector<8xf32>
    %68 = vector.shape_cast %67 : vector<8xf32> to vector<8x1xf32>
    %69 = arith.addf %51, %68 : vector<8x1xf32>
    %70 = arith.mulf %66, %66 : vector<8x256xf32>
    %cst_52 = arith.constant dense<0.000000e+00> : vector<8xf32>
    %71 = vector.multi_reduction <add>, %70, %cst_52 [1] : vector<8x256xf32> to vector<8xf32>
    %72 = vector.shape_cast %71 : vector<8xf32> to vector<8x1xf32>
    %73 = arith.addf %55, %72 : vector<8x1xf32>
    %cst_53 = arith.constant 9.765625E-4 : f32
    %74 = vector.broadcast %cst_53 : f32 to vector<8x1xf32>
    %75 = arith.mulf %69, %74 : vector<8x1xf32>
    %cst_54 = arith.constant 9.765625E-4 : f32
    %76 = vector.broadcast %cst_54 : f32 to vector<8x1xf32>
    %77 = arith.mulf %73, %76 : vector<8x1xf32>
    %78 = arith.mulf %75, %75 : vector<8x1xf32>
    %79 = arith.subf %77, %78 : vector<8x1xf32>
    %cst_55 = arith.constant 0.000000e+00 : f32
    %80 = vector.broadcast %cst_55 : f32 to vector<8x1xf32>
    %81 = arith.maximumf %79, %80 : vector<8x1xf32>
    %cst_56 = arith.constant 9.99999974E-6 : f32
    %82 = vector.broadcast %cst_56 : f32 to vector<8x1xf32>
    %83 = arith.addf %81, %82 : vector<8x1xf32>
    %84 = math.rsqrt %83 : vector<8x1xf32>
    %85 = vector.broadcast %75 : vector<8x1xf32> to vector<8x256xf32>
    %86 = arith.subf %12, %85 : vector<8x256xf32>
    %87 = vector.broadcast %84 : vector<8x1xf32> to vector<8x256xf32>
    %88 = arith.mulf %86, %87 : vector<8x256xf32>
    %cst_57 = arith.constant 0.000000e+00 : f32
    %89 = vector.broadcast %cst_57 : f32 to vector<8x256xf32>
    %90 = arith.maximumf %88, %89 : vector<8x256xf32>
    %c0_58 = arith.constant 0 : index
    %c0_59 = arith.constant 0 : index
    %c0_60 = arith.constant 0 : index
    %c0_61 = arith.constant 0 : index
    %91 = vector.load %arg3[%c0_58, %c0_59, %c0_60, %c0_61] : memref<1x4x8x256xf32, #tpu.memory_space<vmem>>, vector<1x1x8x256xf32>
    %92 = vector.shape_cast %91 : vector<1x1x8x256xf32> to vector<8x256xf32>
    %93 = vector.shape_cast %90 : vector<8x256xf32> to vector<1x1x8x256xf32>
    tpu.vector_store %arg3[%c0_58, %c0_59, %c0_60, %c0_61], %93 {strides = array<i32>} : memref<1x4x8x256xf32, #tpu.memory_space<vmem>>, vector<1x1x8x256xf32>,
    %94 = vector.broadcast %75 : vector<8x1xf32> to vector<8x256xf32>
    %95 = arith.subf %30, %94 : vector<8x256xf32>
    %96 = vector.broadcast %84 : vector<8x1xf32> to vector<8x256xf32>
    %97 = arith.mulf %95, %96 : vector<8x256xf32>
    %cst_62 = arith.constant 0.000000e+00 : f32
    %98 = vector.broadcast %cst_62 : f32 to vector<8x256xf32>
    %99 = arith.maximumf %97, %98 : vector<8x256xf32>
    %c0_63 = arith.constant 0 : index
    %c1_64 = arith.constant 1 : index
    %c0_65 = arith.constant 0 : index
    %c0_66 = arith.constant 0 : index
    %100 = vector.load %arg3[%c0_63, %c1_64, %c0_65, %c0_66] : memref<1x4x8x256xf32, #tpu.memory_space<vmem>>, vector<1x1x8x256xf32>
    %101 = vector.shape_cast %100 : vector<1x1x8x256xf32> to vector<8x256xf32>
    %102 = vector.shape_cast %99 : vector<8x256xf32> to vector<1x1x8x256xf32>
    tpu.vector_store %arg3[%c0_63, %c1_64, %c0_65, %c0_66], %102 {strides = array<i32>} : memref<1x4x8x256xf32, #tpu.memory_space<vmem>>, vector<1x1x8x256xf32>,
    %103 = vector.broadcast %75 : vector<8x1xf32> to vector<8x256xf32>
    %104 = arith.subf %48, %103 : vector<8x256xf32>
    %105 = vector.broadcast %84 : vector<8x1xf32> to vector<8x256xf32>
    %106 = arith.mulf %104, %105 : vector<8x256xf32>
    %cst_67 = arith.constant 0.000000e+00 : f32
    %107 = vector.broadcast %cst_67 : f32 to vector<8x256xf32>
    %108 = arith.maximumf %106, %107 : vector<8x256xf32>
    %c0_68 = arith.constant 0 : index
    %c2_69 = arith.constant 2 : index
    %c0_70 = arith.constant 0 : index
    %c0_71 = arith.constant 0 : index
    %109 = vector.load %arg3[%c0_68, %c2_69, %c0_70, %c0_71] : memref<1x4x8x256xf32, #tpu.memory_space<vmem>>, vector<1x1x8x256xf32>
    %110 = vector.shape_cast %109 : vector<1x1x8x256xf32> to vector<8x256xf32>
    %111 = vector.shape_cast %108 : vector<8x256xf32> to vector<1x1x8x256xf32>
    tpu.vector_store %arg3[%c0_68, %c2_69, %c0_70, %c0_71], %111 {strides = array<i32>} : memref<1x4x8x256xf32, #tpu.memory_space<vmem>>, vector<1x1x8x256xf32>,
    %112 = vector.broadcast %75 : vector<8x1xf32> to vector<8x256xf32>
    %113 = arith.subf %66, %112 : vector<8x256xf32>
    %114 = vector.broadcast %84 : vector<8x1xf32> to vector<8x256xf32>
    %115 = arith.mulf %113, %114 : vector<8x256xf32>
    %cst_72 = arith.constant 0.000000e+00 : f32
    %116 = vector.broadcast %cst_72 : f32 to vector<8x256xf32>
    %117 = arith.maximumf %115, %116 : vector<8x256xf32>
    %c0_73 = arith.constant 0 : index
    %c3_74 = arith.constant 3 : index
    %c0_75 = arith.constant 0 : index
    %c0_76 = arith.constant 0 : index
    %118 = vector.load %arg3[%c0_73, %c3_74, %c0_75, %c0_76] : memref<1x4x8x256xf32, #tpu.memory_space<vmem>>, vector<1x1x8x256xf32>
    %119 = vector.shape_cast %118 : vector<1x1x8x256xf32> to vector<8x256xf32>
    %120 = vector.shape_cast %117 : vector<8x256xf32> to vector<1x1x8x256xf32>
    tpu.vector_store %arg3[%c0_73, %c3_74, %c0_75, %c0_76], %120 {strides = array<i32>} : memref<1x4x8x256xf32, #tpu.memory_space<vmem>>, vector<1x1x8x256xf32>,
    return
  }
  func.func @transform_0(%arg0: i32) -> (i32, i32, i32) {
    %c0_i32 = arith.constant 0 : i32
    %c0_i32_0 = arith.constant 0 : i32
    %c0_i32_1 = arith.constant 0 : i32
    return %arg0, %c0_i32, %c0_i32_0 : i32, i32, i32
  }
  func.func @transform_1(%arg0: i32) -> (i32, i32, i32) {
    %c0_i32 = arith.constant 0 : i32
    %c0_i32_0 = arith.constant 0 : i32
    %c0_i32_1 = arith.constant 0 : i32
    %c0_i32_2 = arith.constant 0 : i32
    return %c0_i32, %c0_i32_0, %c0_i32_1 : i32, i32, i32
  }
  func.func @transform_2(%arg0: i32) -> (i32, i32, i32, i32) {
    %c0_i32 = arith.constant 0 : i32
    %c0_i32_0 = arith.constant 0 : i32
    %c0_i32_1 = arith.constant 0 : i32
    %c0_i32_2 = arith.constant 0 : i32
    return %arg0, %c0_i32, %c0_i32_0, %c0_i32_1 : i32, i32, i32, i32
  }
}

</mosaic_0001>

<bundles_post_ra>
// kernel: unet_up_noise.1
= control target key start
LH: loop header
LB: loop body
LE: loop exit
PB: predicated region body
PF: predicated region fallthrough
CT: control target
= control target key end

     0   :  { %s1020_s9 = smov 0   ;;  %s1123_s0 = inlined_call_operand.vmem [shape: f32[2,36,256], index: 0, kind: input, shape index: {}]   ;;  %s1124_s1 = inlined_call_operand.vmem [shape: f32[8,8,8], index: 1, kind: input, shape index: {}]   ;;  %s1125_s2 = inlined_call_operand.vmem [shape: f32[2,4,8,256], index: 2, kind: output, shape index: {}]  }
   0x1 LB: > { %s944_s10 = sadd.s32 4294967295, %s1002_s9   ;;  %p948_p0 = scmp.ge.s32.totalorder %s1002_s9, 1  ;;  %s1002_s9 = sphi %s1020_s9, %s12_s9  }
   0x2   : > { %p112_p1 = scmp.lt.s32.totalorder %s1002_s9, 3 }
   0x4   : > { %p113_p2 = pnand %p948_p0, %p112_p1 }
   0x5   : > { %p134_p3 = scmp.lt.s32.totalorder (!%p113_p2), %s944_s10, 1  ;;  %v1004_v0 = vmov (!%p113_p2), 0.0   ;;  %v956_v1 = vld [vmem:[%s1124_s1 + $0x18] sm:$0xff] (!%p113_p2)  ;;  %vm166_vm0 = vcmask (!%p113_p2), 64512   ;;  %vm157_vm1 = vcmask (!%p113_p2), 1043456   ;;  %v952_v11 = vld [vmem:[%s1124_s1 + $0x8] sm:$0xff] (!%p113_p2) }
   0x6   : > { %116 = sbr.rel (%p113_p2) target bundleno = 436 (0x1b4), region = 28  ;;  %402 = vmatprep.mubr.f32.mxu1 (!%p113_p2), %v1004_v0  ;;  %234 = vmatprep.mubr.f32.mxu0 (!%p113_p2), %v1004_v0  ;;  %v955_v36 = vld [vmem:[%s1124_s1 + $0x10] sm:$0xff] (!%p113_p2)  ;;  %v144_v39 = vld [vmem:[%s1124_s1] sm:$0xff] (!%p113_p2)  ;;  %v964_v40 = vld [vmem:[%s1124_s1 + $0x38] sm:$0xff] (!%p113_p2) }
   0x7   : > { %v960_v42 = vld [vmem:[%s1124_s1 + $0x28] sm:$0xff] (!%p113_p2)  ;;  %v963_v43 = vld [vmem:[%s1124_s1 + $0x30] sm:$0xff] (!%p113_p2)  ;;  %v959_v44 = vld [vmem:[%s1124_s1 + $0x20] sm:$0xff] (!%p113_p2) }
   0xd   : > { %s1127_s10 = smov (!%p134_p3, %s944_s10), 1 }
   0xe   : > { %s984_s11 = smul.u32 80, %s1127_s10  ;;  %s975_s3 = sshll.u32 %s1127_s10, 6 }
   0xf   : > { %s143_s6 = scalar_lea.vmem %s1125_s2, %s975_s3 }
  0x10   : > { %s1036_s14 = scalar_lea.vmem %s1123_s0, %s984_s11 }
  0x11   : > { %v334_v2 = vld [vmem:[%s1036_s14 + $0x28] sm:$0xff]  ;;  %v1043_v3 = vld [vmem:[%s1036_s14 + $0x20] sm:$0xff]  ;;  %v150_v4 = vld [vmem:[%s1036_s14 + $0x18] sm:$0xf0] }
  0x12   : > { %338 = vmatprep.subr.mxu1 %v334_v2  ;;  %v152_v5 = vld [vmem:[%s1036_s14 + $0x28] sm:$0xf]  ;;  %v161_v6 = vrot.slane %v150_v4, 4  ;;  %v149_v7 = vld [vmem:[%s1036_s14 + $0x10] sm:$0xf0]  ;;  %v145_v14 = vld [vmem:[%s1036_s14] sm:$0xff] }
  0x13   : > { %339 = vmatpush1.msra.mxu1 %v1043_v3  ;;  %v162_v8 = vrot.slane %v152_v5, 4  ;;  %v151_v9 = vld [vmem:[%s1036_s14 + $0x20] sm:$0xf]  ;;  %v158_v10 = vrot.slane %v149_v7, 4  ;;  %v146_v12 = vld [vmem:[%s1036_s14 + $0x8] sm:$0xff]  ;;  %v510_v33 = vld [vmem:[%s1036_s14 + $0x38] sm:$0xff] }
  0x14   : > { %957 = vmatmul.mubr.msk.f32.vlgmr.msra.gmra.mrb[0].mxu1 %vm166_vm0, %v956_v1  ;;  %v159_v13 = vrot.slane %v151_v9, 4  ;;  %v328_v15 = vld [vmem:[%s1036_s14 + $0x8] sm:$0xf0]  ;;  %v330_v16 = vld [vmem:[%s1036_s14 + $0x18] sm:$0xf]  ;;  %v509_v41 = vld [vmem:[%s1036_s14 + $0x30] sm:$0xff] }
  0x15   : > { %v163_v17 = vsel %vm157_vm1, %v161_v6, %v162_v8  ;;  %v416_v18 = vrot.slane %v328_v15, 4  ;;  %v417_v19 = vrot.slane %v330_v16, 4  ;;  %v327_v20 = vld [vmem:[%s1036_s14] sm:$0xf0]  ;;  %v329_v21 = vld [vmem:[%s1036_s14 + $0x10] sm:$0xf]  ;;  %488 = vmatprep.mubr.f32.mxu1 %v1004_v0 }
  0x16   : > { %170 = vmatprep.subr.mxu0 %v163_v17  ;;  %v160_v22 = vsel %vm157_vm1, %v158_v10, %v159_v13  ;;  %v413_v23 = vrot.slane %v327_v20, 4  ;;  %v414_v24 = vrot.slane %v329_v21, 4  ;;  %v674_v25 = vld [vmem:[%s1036_s14 + $0x38] sm:$0xf0]  ;;  %v676_v26 = vld [vmem:[%s1036_s14 + $0x48] sm:$0xf] }
  0x17   : > { %171 = vmatpush1.msra.mxu0 %v160_v22  ;;  %v418_v27 = vsel %vm157_vm1, %v416_v18, %v417_v19  ;;  %v684_v28 = vrot.slane %v674_v25, 4  ;;  %v685_v29 = vrot.slane %v676_v26, 4  ;;  %v673_v30 = vld [vmem:[%s1036_s14 + $0x30] sm:$0xf0]  ;;  %v675_v31 = vld [vmem:[%s1036_s14 + $0x40] sm:$0xf] }
  0x18   : > { %953 = vmatmul.mubr.msk.f32.vlgmr.msra.gmra.mrb[0].mxu0 %vm166_vm0, %v952_v11  ;;  %244 = vmatprep.subr.mxu0 %v146_v12  ;;  %v415_v32 = vsel %vm157_vm1, %v413_v23, %v414_v24  ;;  %v681_v34 = vrot.slane %v673_v30, 4  ;;  %v682_v35 = vrot.slane %v675_v31, 4 }
  0x19   : > { %245 = vmatpush1.msra.mxu0 %v145_v14  ;;  %424 = vmatprep.subr.mxu1 %v418_v27  ;;  %v686_v37 = vsel %vm157_vm1, %v684_v28, %v685_v29 }
  0x1a   : > { %425 = vmatpush1.msra.mxu1 %v415_v32  ;;  %308 = vmatprep.mubr.f32.mxu0 %v1004_v0  ;;  %v683_v38 = vsel %vm157_vm1, %v681_v34, %v682_v35 }
  0x1b   : > { %692 = vmatprep.subr.mxu1 %v686_v37  ;;  %514 = vmatprep.subr.mxu0 %v510_v33 }
  0x1c   : > { %958 = vmatmul.mubr.msk.f32.vlgmr.msra.gmra.mrb[0].mxu1 %vm166_vm0, %v955_v36 }
  0x1d   : > { %693 = vmatpush1.msra.mxu1 %v683_v38  ;;  %756 = vmatprep.mubr.f32.mxu1 %v1004_v0 }
  0x1e   : > { %766 = vmatprep.subr.mxu1 %v334_v2 }
  0x20   : > { %954 = vmatmul.mubr.msk.f32.vlgmr.msra.gmra.mrb[0].mxu0 %vm166_vm0, %v144_v39  ;;  %965 = vmatmul.mubr.msk.f32.vlgmr.msra.gmra.mrb[2].mxu1 %vm166_vm0, %v964_v40 }
  0x21   : > { %515 = vmatpush1.msra.mxu0 %v509_v41  ;;  %578 = vmatprep.mubr.f32.mxu0 %v1004_v0 }
  0x22   : > { %588 = vmatprep.subr.mxu0 %v163_v17  ;;  %767 = vmatpush1.msra.mxu1 %v1043_v3 }
  0x23   : > { %830 = vmatprep.mubr.f32.mxu1 %v1004_v0 }
  0x24   : > { %961 = vmatmul.mubr.msk.f32.vlgmr.msra.gmra.mrb[2].mxu0 %vm166_vm0, %v960_v42 }
  0x25   : > { %589 = vmatpush1.msra.mxu0 %v160_v22  ;;  %652 = vmatprep.mubr.f32.mxu0 %v1004_v0 }
  0x28   : > { %966 = vmatmul.mubr.msk.f32.vlgmr.msra.gmra.mrb[2].mxu1 %vm166_vm0, %v963_v43 }
  0x2c   : > { %962 = vmatmul.mubr.msk.f32.vlgmr.msra.gmra.mrb[2].mxu0 %vm166_vm0, %v959_v44 }
  0xef   : > { %v1104_v45 = vpop.f32.mrb[0].mxu1 }
  0xf0   : > { %v1106_v46 = vpop.f32.mrb[1].mxu1  ;;  %v499_v47 = vmul.f32 %v1104_v45, %v1104_v45 }
  0xf1   : > { %v495_v48 = vadd.f32 %v1106_v46, %v1104_v45  ;;  %v500_v49 = vmul.f32 %v1106_v46, %v1106_v46 }
  0xf3   : > { %v310_v50 = vpop.f32.mrb[0].mxu0  ;;  %496 = vadd.xlane.f32.xlu0 %v495_v48  ;;  %v501_v51 = vadd.f32 %v500_v49, %v499_v47 }
  0xf4   : > { %v312_v52 = vpop.f32.mrb[1].mxu0  ;;  %v319_v53 = vmul.f32 %v310_v50, %v310_v50 }
  0xf5   : > { %502 = vadd.xlane.f32.xlu1 %v501_v51  ;;  %v315_v54 = vadd.f32 %v312_v52, %v310_v50  ;;  %v320_v55 = vmul.f32 %v312_v52, %v312_v52 }
  0xf7   : > { %316 = vadd.xlane.f32.xlu0 %v315_v54  ;;  %v321_v56 = vadd.f32 %v320_v55, %v319_v53 }
  0xf9   : > { %322 = vadd.xlane.f32.xlu1 %v321_v56 }
  0xfb   : > { %v832_v57 = vpop.f32.mrb[2].mxu1 }
  0xfc   : > { %v834_v58 = vpop.f32.mrb[3].mxu1  ;;  %v841_v59 = vmul.f32 %v832_v57, %v832_v57 }
  0xfd   : > { %v842_v60 = vmul.f32 %v834_v58, %v834_v58  ;;  %v837_v61 = vadd.f32 %v834_v58, %v832_v57 }
  0xff   : > { %v654_v62 = vpop.f32.mrb[2].mxu0  ;;  %v843_v63 = vadd.f32 %v842_v60, %v841_v59 }
 0x100   : > { %v656_v0 = vpop.f32.mrb[3].mxu0  ;;  %v663_v1 = vmul.f32 %v654_v62, %v654_v62 }
 0x101   : > { %v664_v2 = vmul.f32 %v656_v0, %v656_v0  ;;  %v659_v3 = vadd.f32 %v656_v0, %v654_v62 }
 0x103   : > { %660 = vadd.xlane.f32.xlu0 %v659_v3  ;;  %v665_v4 = vadd.f32 %v664_v2, %v663_v1 }
 0x105   : > { %666 = vadd.xlane.f32.xlu1 %v665_v4 }
 0x107   : > { %838 = vadd.xlane.f32.xlu0 %v837_v61 }
 0x109   : > { %844 = vadd.xlane.f32.xlu1 %v843_v63 }
 0x180   : > { %v497_v5 = vpop.xlane.xlu0 %496 }
 0x182   : > { %v503_v6 = vpop.xlane.xlu1 %502 }
 0x184   : > { %v317_v7 = vpop.xlane.xlu0 %316 }
 0x185   : > { %v498_v10 = vadd.f32 %v497_v5, %v317_v7 }
 0x186   : > { %v323_v8 = vpop.xlane.xlu1 %322 }
 0x187   : > { %v504_v12 = vadd.f32 %v503_v6, %v323_v8 }
 0x190   : > { %v661_v9 = vpop.xlane.xlu0 %660 }
 0x191   : > { %v662_v13 = vadd.f32 %v661_v9, %v498_v10 }
 0x192   : > { %v667_v11 = vpop.xlane.xlu1 %666 }
 0x193   : > { %v668_v15 = vadd.f32 %v667_v11, %v504_v12 }
 0x194   : > { %v839_v14 = vpop.xlane.xlu0 %838 }
 0x195   : > { %v840_v16 = vadd.f32 %v839_v14, %v662_v13 }
 0x196   : > { %v845_v17 = vpop.xlane.xlu1 %844 }
 0x197   : > { %v847_v18 = vmul.f32 0.0009765625, %v840_v16  ;;  %v846_v19 = vadd.f32 %v845_v17, %v668_v15 }
 0x199   : > { %v848_v20 = vmul.f32 0.0009765625, %v846_v19  ;;  %v849_v21 = vmul.f32 %v847_v18, %v847_v18  ;;  %v854_v25 = vsub.f32 %v310_v50, %v847_v18  ;;  %v855_v26 = vsub.f32 %v312_v52, %v847_v18 }
 0x19a   : > { %v862_v27 = vsub.f32 %v1104_v45, %v847_v18  ;;  %v863_v28 = vsub.f32 %v1106_v46, %v847_v18  ;;  %v871_v30 = vsub.f32 %v654_v62, %v847_v18  ;;  %v872_v31 = vsub.f32 %v656_v0, %v847_v18 }
 0x19b   : > { %v850_v22 = vsub.f32 %v848_v20, %v849_v21  ;;  %v880_v32 = vsub.f32 %v832_v57, %v847_v18  ;;  %v881_v33 = vsub.f32 %v834_v58, %v847_v18 }
 0x19d   : > { %v851_v23 = vmax.f32 %v850_v22, 0.0 }
 0x19f   : > { %v852_v24 = vadd.f32 1e-05, %v851_v23 }
 0x1a1   : > { %994 = vrsqrt.f32 %v852_v24 }
 0x1ab   : > { %v995_v29 = vpop.eup %994 }
 0x1ac   : > { %v856_v34 = vmul.f32 %v995_v29, %v854_v25  ;;  %v857_v35 = vmul.f32 %v995_v29, %v855_v26  ;;  %v864_v36 = vmul.f32 %v995_v29, %v862_v27  ;;  %v865_v37 = vmul.f32 %v995_v29, %v863_v28 }
 0x1ad   : > { %v873_v38 = vmul.f32 %v995_v29, %v871_v30  ;;  %v874_v39 = vmul.f32 %v995_v29, %v872_v31  ;;  %v882_v40 = vmul.f32 %v995_v29, %v880_v32  ;;  %v883_v41 = vmul.f32 %v995_v29, %v881_v33 }
 0x1ae   : > { %v858_v42 = vmax.f32 %v856_v34, 0.0  ;;  %v859_v43 = vmax.f32 %v857_v35, 0.0  ;;  %v866_v44 = vmax.f32 %v864_v36, 0.0  ;;  %v867_v45 = vmax.f32 %v865_v37, 0.0 }
 0x1af   : > { %v875_v46 = vmax.f32 %v873_v38, 0.0  ;;  %v876_v47 = vmax.f32 %v874_v39, 0.0  ;;  %v884_v48 = vmax.f32 %v882_v40, 0.0  ;;  %v885_v49 = vmax.f32 %v883_v41, 0.0 }
 0x1b0   : > { %860 = vst [vmem:[%s143_s6] sm:$0xff] %v858_v42  ;;  %861 = vst [vmem:[%s143_s6 + $0x8] sm:$0xff] %v859_v43 }
 0x1b1   : > { %967 = vst [vmem:[%s143_s6 + $0x10] sm:$0xff] %v866_v44  ;;  %968 = vst [vmem:[%s143_s6 + $0x18] sm:$0xff] %v867_v45 }
 0x1b2   : > { %969 = vst [vmem:[%s143_s6 + $0x20] sm:$0xff] %v875_v46  ;;  %970 = vst [vmem:[%s143_s6 + $0x28] sm:$0xff] %v876_v47 }
 0x1b3   : > { %971 = vst [vmem:[%s143_s6 + $0x30] sm:$0xff] %v884_v48  ;;  %972 = vst [vmem:[%s143_s6 + $0x38] sm:$0xff] %v885_v49 }
 0x1b4 PF: > { %s12_s9 = sadd.s32 1, %s1002_s9  }
 0x1b5   : > { %p9_p4 = scmp.ge.s32.totalorder %s12_s9, 4  }
 0x1b7   :  { %11 = sbr.rel (!%p9_p4) target bundleno = 1 (0x1), region = 68 }

</bundles_post_ra>
